<compile_context>
chip_gen: v6e
topology: v6e:2x2x1
jax: 0.10.0
libtpu: 0.0.40
codegen_flags: <defaults>
</compile_context>

<pallas_src>
import jax
import jax.numpy as jnp
from jax.experimental import pallas as pl
from jax.experimental.pallas import tpu as pltpu

LANES = 128
ACC_ROWS = 8                  # accumulator tile = one f32 vreg: (8, 128)
NUM_CORE_SPLITS = 2           # leading "parallel" grid axis (2 TCs on v7x)


def _round_up(x: int, m: int) -> int:
    return ((x + m - 1) // m) * m


def _target_block_bytes() -> int:
    """Per-input block size target, by chip generation (bytes)."""
    try:
        kind = jax.devices()[0].device_kind.lower()
    except Exception:
        return 2 << 20
    if "v7" in kind:
        return 8 << 20       # 3.2 TB/s per TC: big steps; 4x8MiB buffers << 64 MiB VMEM
    if "v6" in kind:
        return 4 << 20       # 16 MiB of double-buffered inputs, under 32 MiB scoped default
    return 2 << 20           # v5e & fallback: stay under the 16 MiB scoped default


def _make_huber_kernel(delta: float, rows: int, block_rows: int,
                       inner_steps: int, needs_mask: bool):
    delta = float(delta)               # Python float -> literal
    two_delta = 2.0 * delta
    delta_sq = delta * delta
    full_blocks = rows // block_rows   # blocks that are entirely in-bounds

    def kernel(pred_ref, target_ref, acc_ref):
        c = pl.program_id(0)           # core-split index ("parallel")
        i = pl.program_id(1)           # reduction step ("arbitrary")

        @pl.when(i == 0)
        def _init():
            acc_ref[...] = jnp.zeros_like(acc_ref)

        diff = pred_ref[...].astype(jnp.float32) - target_ref[...].astype(jnp.float32)
        abs_diff = jnp.abs(diff)
        # 2 * Huber(diff); the 0.5 is folded into the wrapper's divide by 2n.
        loss2 = jnp.where(abs_diff < delta,
                          diff * diff,
                          two_delta * abs_diff - delta_sq)

        def accumulate(vals):
            # (block_rows, 128) -> (8, 128) with sublane-aligned VPU adds only.
            acc_ref[...] += vals.reshape(-1, ACC_ROWS, LANES).sum(axis=0)

        if needs_mask:
            g = c * inner_steps + i    # global block index

            @pl.when(g < full_blocks)
            def _full():               # hot path: no mask cost
                accumulate(loss2)

            @pl.when(g >= full_blocks)
            def _tail():               # partial / empty blocks: mask garbage rows
                valid = rows - g * block_rows
                row_ids = jax.lax.broadcasted_iota(jnp.int32, loss2.shape, 0)
                accumulate(jnp.where(row_ids < valid, loss2, 0.0))
        else:
            accumulate(loss2)

    return kernel


def huber_loss(pred: jax.Array, target: jax.Array, delta: float = 1.0) -> jax.Array:
    assert pred.shape == target.shape, "pred and target must have the same shape"
    n = pred.size
    assert n > 0

    itemsize = jnp.dtype(pred.dtype).itemsize
    # Native TPU tile height: 8 rows for 32-bit, 16 for bf16, 32 for 8-bit.
    sub = ACC_ROWS * max(1, 4 // itemsize)

    p = pred.reshape(-1)
    t = target.reshape(-1)

    rows = _round_up(pl.cdiv(n, LANES), sub)
    padded_n = rows * LANES
    if padded_n != n:
        # Small tile-alignment pad only (< sub*128 elems); zeros contribute
        # exactly 0 to the Huber sum. Arrays already tile-aligned skip this.
        p = jnp.pad(p, (0, padded_n - n))
        t = jnp.pad(t, (0, padded_n - n))

    p2d = p.reshape(rows, LANES)
    t2d = t.reshape(rows, LANES)

    # Block sized in bytes (chip-dependent sweet spot), never taller than one
    # core-split's worth of rows, always a multiple of the native tile height.
    cap_rows = max(sub, (_target_block_bytes() // (LANES * itemsize)) // sub * sub)
    split_rows = _round_up(pl.cdiv(rows, NUM_CORE_SPLITS), sub)
    block_rows = min(cap_rows, split_rows)

    total_blocks = pl.cdiv(rows, block_rows)
    inner_steps = pl.cdiv(total_blocks, NUM_CORE_SPLITS)
    last_block = total_blocks - 1
    needs_mask = (NUM_CORE_SPLITS * inner_steps * block_rows != rows)

    kernel = _make_huber_kernel(float(delta), rows, block_rows, inner_steps, needs_mask)

    def in_map(c, i):
        # Clamp so over-covering (empty) blocks re-read a valid block; their
        # contribution is masked to zero inside the kernel.
        return (jnp.minimum(c * inner_steps + i, last_block), 0)

    block_bytes = block_rows * LANES * itemsize
    vmem_limit = int(min(4 * block_bytes + (8 << 20), 64 << 20))

    cost = pl.CostEstimate(
        flops=8 * n,
        transcendentals=0,
        bytes_accessed=2 * n * itemsize + NUM_CORE_SPLITS * ACC_ROWS * LANES * 4,
    )

    acc = pl.pallas_call(
        kernel,
        out_shape=jax.ShapeDtypeStruct((NUM_CORE_SPLITS * ACC_ROWS, LANES), jnp.float32),
        grid_spec=pltpu.PrefetchScalarGridSpec(
            num_scalar_prefetch=0,
            grid=(NUM_CORE_SPLITS, inner_steps),
            in_specs=[
                pl.BlockSpec((block_rows, LANES), in_map),
                pl.BlockSpec((block_rows, LANES), in_map),
            ],
            # Per core-split, a resident (8,128) accumulator tile across the
            # reduction axis.
            out_specs=pl.BlockSpec((ACC_ROWS, LANES), lambda c, i: (c, 0)),
        ),
        compiler_params=pltpu.CompilerParams(
            dimension_semantics=("parallel", "arbitrary"),
            vmem_limit_bytes=vmem_limit,
        ),
        cost_estimate=cost,
    )(p2d, t2d)

    # TODO(synk): optionally fold this tiny (16,128) cross-lane reduce into the
    # kernel's last step (scalar SMEM output) to save one small XLA dispatch.
    return jnp.sum(acc) / (2.0 * n)


def huber_loss_ref(pred, target, delta=1.0):
    diff = pred.astype(jnp.float32) - target.astype(jnp.float32)
    abs_diff = jnp.abs(diff)
    quadratic = jnp.minimum(abs_diff, delta)
    linear = abs_diff - quadratic
    return jnp.mean(0.5 * quadratic ** 2 + delta * linear)


if __name__ == "__main__":
    key = jax.random.PRNGKey(0)
    k1, k2 = jax.random.split(key)

    # Shapes consistent with a regression head output, e.g. (batch, C, H, W).
    pred = jax.random.normal(k1, (2, 4, 16, 16), dtype=jnp.float32) * 2.0
    target = jax.random.normal(k2, (2, 4, 16, 16), dtype=jnp.float32) * 2.0
    loss = jax.block_until_ready(huber_loss(pred, target, delta=1.0))
    ref = huber_loss_ref(pred, target, delta=1.0)
    assert jnp.allclose(loss, ref, rtol=1e-5, atol=1e-6), (loss, ref)

    # Ragged shape: exercises the tile-alignment pad + in-kernel tail masking.
    p3 = jax.random.normal(k1, (3, 5, 7), dtype=jnp.float32)
    t3 = jax.random.normal(k2, (3, 5, 7), dtype=jnp.float32)
    loss2 = jax.block_until_ready(huber_loss(p3, t3, delta=1.0))
    ref2 = huber_loss_ref(p3, t3, delta=1.0)
    assert jnp.allclose(loss2, ref2, rtol=1e-5, atol=1e-6), (loss2, ref2)

    # Medium shape: multiple blocks, partial last block, non-default delta.
    p4 = jax.random.normal(k1, (1200, 1250), dtype=jnp.float32) * 1.5
    t4 = jax.random.normal(k2, (1200, 1250), dtype=jnp.float32) * 1.5
    loss3 = jax.block_until_ready(huber_loss(p4, t4, delta=0.7))
    ref3 = huber_loss_ref(p4, t4, delta=0.7)
    assert jnp.allclose(loss3, ref3, rtol=1e-4, atol=1e-6), (loss3, ref3)

    print("KERNEL_OK")
</pallas_src>

<mosaic_0001>
module attributes {stable_mosaic.version = 11 : i64} {
  func.func @kernel(%arg0: i32, %arg1: i32, %arg2: memref<8x128xf32, #tpu.memory_space<vmem>>, %arg3: memref<8x128xf32, #tpu.memory_space<vmem>>, %arg4: memref<8x128xf32, #tpu.memory_space<vmem>>) attributes {dimension_semantics = [#tpu.dimension_semantics<parallel>, #tpu.dimension_semantics<arbitrary>], iteration_bounds = array<i64: 2, 1>, scalar_prefetch = 0 : i64, scratch_operands = 0 : i64, tpu.core_type = #tpu.core_type<tc>, window_params = [{transform_indices = @transform_0, window_bounds = array<i64: 8, 128>}, {transform_indices = @transform_1, window_bounds = array<i64: 8, 128>}, {transform_indices = @transform_2, window_bounds = array<i64: 8, 128>}]} {
    %c0_i32 = arith.constant 0 : i32
    %0 = arith.cmpi eq, %arg1, %c0_i32 : i32
    %1 = arith.extui %0 : i1 to i32
    %c0_i32_0 = arith.constant 0 : i32
    %2 = arith.cmpi ne, %1, %c0_i32_0 : i32
    scf.if %2 {
      %cst_11 = arith.constant 0.000000e+00 : f32
      %20 = vector.broadcast %cst_11 : f32 to vector<8x128xf32>
      %c0_12 = arith.constant 0 : index
      %c0_13 = arith.constant 0 : index
      %21 = vector.load %arg4[%c0_12, %c0_13] : memref<8x128xf32, #tpu.memory_space<vmem>>, vector<8x128xf32>
      tpu.vector_store %arg4[%c0_12, %c0_13], %20 {strides = array<i32>} : memref<8x128xf32, #tpu.memory_space<vmem>>, vector<8x128xf32>,
    } else {
    }
    %c0 = arith.constant 0 : index
    %c0_1 = arith.constant 0 : index
    %3 = vector.load %arg2[%c0, %c0_1] : memref<8x128xf32, #tpu.memory_space<vmem>>, vector<8x128xf32>
    %c0_2 = arith.constant 0 : index
    %c0_3 = arith.constant 0 : index
    %4 = vector.load %arg3[%c0_2, %c0_3] : memref<8x128xf32, #tpu.memory_space<vmem>>, vector<8x128xf32>
    %5 = arith.subf %3, %4 : vector<8x128xf32>
    %6 = math.absf %5 : vector<8x128xf32>
    %cst = arith.constant 1.000000e+00 : f32
    %7 = vector.broadcast %cst : f32 to vector<8x128xf32>
    %8 = arith.cmpf olt, %6, %7 : vector<8x128xf32>
    %9 = arith.mulf %5, %5 : vector<8x128xf32>
    %cst_4 = arith.constant 2.000000e+00 : f32
    %10 = vector.broadcast %cst_4 : f32 to vector<8x128xf32>
    %11 = arith.mulf %10, %6 : vector<8x128xf32>
    %cst_5 = arith.constant 1.000000e+00 : f32
    %12 = vector.broadcast %cst_5 : f32 to vector<8x128xf32>
    %13 = arith.subf %11, %12 : vector<8x128xf32>
    %14 = arith.select %8, %9, %13 : vector<8x128xi1>, vector<8x128xf32>
    %c0_6 = arith.constant 0 : index
    %c0_7 = arith.constant 0 : index
    %15 = vector.load %arg4[%c0_6, %c0_7] : memref<8x128xf32, #tpu.memory_space<vmem>>, vector<8x128xf32>
    %16 = vector.shape_cast %14 : vector<8x128xf32> to vector<1x8x128xf32>
    %cst_8 = arith.constant dense<0.000000e+00> : vector<8x128xf32>
    %17 = vector.multi_reduction <add>, %16, %cst_8 [0] : vector<1x8x128xf32> to vector<8x128xf32>
    %18 = arith.addf %15, %17 : vector<8x128xf32>
    %c0_9 = arith.constant 0 : index
    %c0_10 = arith.constant 0 : index
    %19 = vector.load %arg4[%c0_9, %c0_10] : memref<8x128xf32, #tpu.memory_space<vmem>>, vector<8x128xf32>
    tpu.vector_store %arg4[%c0_9, %c0_10], %18 {strides = array<i32>} : memref<8x128xf32, #tpu.memory_space<vmem>>, vector<8x128xf32>,
    return
  }
  func.func @transform_0(%arg0: i32, %arg1: i32) -> (i32, i32) {
    %c1_i32 = arith.constant 1 : i32
    %0 = arith.muli %arg0, %c1_i32 : i32
    %1 = arith.addi %0, %arg1 : i32
    %c1_i32_0 = arith.constant 1 : i32
    %2 = arith.minsi %1, %c1_i32_0 : i32
    %c0_i32 = arith.constant 0 : i32
    %c0_i32_1 = arith.constant 0 : i32
    return %2, %c0_i32 : i32, i32
  }
  func.func @transform_1(%arg0: i32, %arg1: i32) -> (i32, i32) {
    %c1_i32 = arith.constant 1 : i32
    %0 = arith.muli %arg0, %c1_i32 : i32
    %1 = arith.addi %0, %arg1 : i32
    %c1_i32_0 = arith.constant 1 : i32
    %2 = arith.minsi %1, %c1_i32_0 : i32
    %c0_i32 = arith.constant 0 : i32
    %c0_i32_1 = arith.constant 0 : i32
    return %2, %c0_i32 : i32, i32
  }
  func.func @transform_2(%arg0: i32, %arg1: i32) -> (i32, i32) {
    %c0_i32 = arith.constant 0 : i32
    %c0_i32_0 = arith.constant 0 : i32
    return %arg0, %c0_i32 : i32, i32
  }
}

</mosaic_0001>

<bundles_post_ra>
// kernel: tpu_custom_call.1
= control target key start
LH: loop header
LB: loop body
LE: loop exit
PB: predicated region body
PF: predicated region fallthrough
CT: control target
= control target key end

     0   :  { %s850_s0 = inlined_call_operand.hbm [shape: f32[16,128], index: 0, kind: input, shape index: {}]   ;;  %s851_s1 = inlined_call_operand.hbm [shape: f32[16,128], index: 1, kind: input, shape index: {}]   ;;  %s852_s2 = inlined_call_operand.hbm [shape: f32[16,128], index: 2, kind: output, shape index: {}]  }
   0x1   :  { %853 = sst [smem:[#allocation11_spill]] %s850_s0 }
   0x2   :  { %7 = vsyncpa [#allocation3], 0 }
   0x3   :  { %9 = vsyncpa [#allocation3 + $0x1], 0 }
   0x4   :  { %10 = vsyncpa [#allocation6], 0 }
   0x5   :  { %12 = vsyncpa [#allocation6 + $0x1], 0 }
   0x6   :  { %13 = vsyncpa [#allocation4], 0 }
   0x7   :  { %15 = vsyncpa [#allocation4 + $0x1], 0  ;;  %s658_s9 = smov 0   ;;  %s660_s10 = smov 0  }
   0x8   :  { %s662_s11 = smov 0   ;;  %s664_s12 = smov 0  }
   0x9   :  { %s666_s13 = smov 0   ;;  %s668_s14 = smov 0  }
   0xa   :  { %s670_s15 = smov 0   ;;  %s672_s16 = smov 0  }
   0xb   :  { %s674_s17 = smov 0  }
   0xc LB: > { %s365_s18 = sadd.s32 4294967295, %s638_s17   ;;  %s366_s19 = sadd.s32 4294967294, %s638_s17   ;;  %s638_s17 = sphi %s674_s17, %s21_s17   ;;  %s634_s16 = sphi %s672_s16, %s869_s16   ;;  %s630_s15 = sphi %s670_s15, %s868_s15   ;;  %s626_s14 = sphi %s668_s14, %s867_s14   ;;  %s622_s13 = sphi %s666_s13, %s866_s13   ;;  %s618_s12 = sphi %s664_s12, %s865_s12   ;;  %s614_s11 = sphi %s662_s11, %s864_s11   ;;  %s610_s10 = sphi %s660_s10, %s863_s10   ;;  %s606_s9 = sphi %s658_s9, %s862_s9  }
   0xd   : > { %s33_s20 = sadd.s32 1, %s634_s16  ;;  %p38_p0 = scmp.lt.s32.totalorder %s634_s16, 1 }
   0xe   : > { %p35_p1 = scmp.ge.s32.totalorder %s33_s20, 2  ;;  %s46_s21 = sadd.s32 1, %s626_s14 }
   0xf   : > { %s707_s22 = scalar_select %p38_p0, %s634_s16, 1 }
  0x10   : > { %s871_s20 = smov (%p35_p1, %s33_s20), 0  ;;  %p53_p2 = scmp.ne.s32.totalorder %s626_s14, %s622_s13 }
  0x11   : > { %p54_p3 = scmp.eq.s32.totalorder %s638_s17, 0  ;;  %p41_p4 = scmp.lt.s32.totalorder %s871_s20, 1 }
  0x12   : > { %p59_p5 = scmp.ne.s32.totalorder %s622_s13, %s618_s12  ;;  %p60_p7 = scmp.eq.s32.totalorder %s365_s18, 0 }
  0x13   : > { %p716_p6 = por %p54_p3, %p53_p2  ;;  %s101_s26 = ssub.s32 %s634_s16, %s871_s20 }
  0x14   : > { %s42_s24 = scalar_select %p41_p4, %s871_s20, 1 }
  0x15   : > { %p721_p8 = por %p60_p7, %p59_p5  ;;  %p102_p9 = scmp.eq.s32.totalorder %s101_s26, 0 }
  0x16   : > { %s43_s27 = ssub.s32 %s707_s22, %s42_s24  ;;  %s104_s28 = sadd.s32 1, %s614_s11 }
  0x17   : > { %p44_p10 = scmp.eq.s32.totalorder %s43_s27, 0  ;;  %p114_p11 = scmp.ne.s32.totalorder %s614_s11, %s610_s10 }
  0x18   : > { %s730_s29 = scalar_select %p102_p9, %s614_s11, %s104_s28  }
  0x19   : > { %s733_s30 = scalar_select %p44_p10, %s626_s14, %s46_s21  }
  0x1a   : > { %p115_p12 = scmp.eq.s32.totalorder %s365_s18, 1  ;;  %p120_p13 = scmp.ne.s32.totalorder %s610_s10, %s606_s9 }
  0x1b   : > { %p121_p0 = scmp.eq.s32.totalorder %s366_s19, 1  ;;  %p399_p4 = scmp.lt.s32.totalorder %s638_s17, 2 }
  0x1c   : > { %p739_p1 = por %p115_p12, %p114_p11  ;;  %s750_s5 = sand.u32 1, %s626_s14  }
  0x1d   : > { %p744_p3 = por %p121_p0, %p120_p13  ;;  %s370_s6 = sshll.u32 %s707_s22, 7 }
  0x1e   : > { %s369_s7 = sshll.u32 %s750_s5, 3  ;;  %s858_s0 = sld [smem:[#allocation11_spill]] }
  0x1f   : > { %s145_s19 = scalar_lea.vmem [#allocation2], %s369_s7  ;;  %p759_p5 = pnand %p399_p4, %p716_p6 }
  0x20   : > { %s155_s21 = sshll.u32 %s145_s19, 4  ;;  %p373_p7 = scmp.ge.s32.totalorder %s638_s17, 1  ;;  %s156_s21 = int_to_ptr.vmem [resolvable:$true] %s155_s21 }
  0x21   : > { %p181_p9 = scmp.lt.s32.totalorder %s638_s17, 3  ;;  %s142_s26 = scalar_lea.sflag [#allocation3], %s750_s5 }
  0x22   : > { %p476_p10 = pneg %p759_p5  ;;  %s487_s22 = scalar_lea.vmem %s156_s21, 128 }
  0x23   : > { %p488_p11 = scmp.ne.s32.totalorder %s156_s21, %s487_s22  ;;  %s640_s27 = smov [#allocation2]  }
  0x24   : > { %s153_s18 = scalar_lea.hbm %s858_s0, %s370_s6  ;;  %s492_s23 = sshll.u32 %s640_s27, 4  ;;  %s493_s23 = int_to_ptr.vmem [resolvable:$false] %s492_s23 }
  0x25   : > { %p490_p12 = pnand %p488_p11, %p476_p10  ;;  %s494_s28 = scalar_lea.vmem %s493_s23, 256 }
  0x26   : > { %p495_p6 = scmp.lt.s32.totalorder %s156_s21, %s493_s23  ;;  %p496_p0 = scmp.lt.s32.totalorder %s494_s28, %s487_s22 }
  0x27   : > { %p491_p13 = pneg %p490_p12 }
  0x28   : > { %p497_p4 = por %p496_p0, %p495_p6 }
  0x2a   : > { %p498_p2 = pnand %p497_p4, %p491_p13 }
  0x2c   : > { %501 = shalt.err (!%p498_p2)
}
  0x2d   : > { %391 = dma.hbm_to_vmem [thread:$0]  (!%p759_p5), %s153_s18, 128, %s156_s21, %s142_s26  }
  0x2e   : > { %p777_p11 = pnand %p373_p7, %p181_p9  ;;  %s174_s22 = scalar_lea.hbm %s851_s1, %s370_s6 }
  0x2f   : > { %s166_s27 = scalar_lea.vmem [#allocation5], %s369_s7  ;;  %s163_s28 = scalar_lea.sflag [#allocation6], %s750_s5 }
  0x30   : > { %s176_s23 = sshll.u32 %s166_s27, 4  ;;  %s641_s18 = smov [#allocation5]   ;;  %s177_s23 = int_to_ptr.vmem [resolvable:$true] %s176_s23 }
  0x31   : > { %s515_s0 = scalar_lea.vmem %s177_s23, 128  ;;  %s520_s21 = sshll.u32 %s641_s18, 4  ;;  %s521_s21 = int_to_ptr.vmem [resolvable:$false] %s520_s21 }
  0x32   : > { %p516_p2 = scmp.ne.s32.totalorder %s177_s23, %s515_s0  ;;  %s522_s26 = scalar_lea.vmem %s521_s21, 256 }
  0x33   : > { %p523_p7 = scmp.lt.s32.totalorder %s177_s23, %s521_s21  ;;  %p524_p9 = scmp.lt.s32.totalorder %s522_s26, %s515_s0 }
  0x34   : > { %p518_p12 = pnand %p516_p2, %p476_p10 }
  0x35   : > { %p525_p6 = por %p524_p9, %p523_p7 }
  0x36   : > { %p519_p13 = pneg %p518_p12 }
  0x38   : > { %p526_p0 = pnand %p525_p6, %p519_p13 }
  0x3a   : > { %529 = shalt.err (!%p526_p0)
}
  0x3b   : > { %394 = dma.hbm_to_vmem [thread:$0]  (!%p759_p5), %s174_s22, 128, %s177_s23, %s163_s28  }
  0x3c   : > { %185 = sbr.rel (%p777_p11) target bundleno = 93 (0x5d), region = 28  ;;  %s187_s5 = sand.u32 (!%p777_p11), 1, %s622_s13  }
  0x3d   : > { %s374_s6 = sshll.u32 (!%p777_p11), %s187_s5, 3  ;;  %s188_s7 = scalar_lea.sflag (!%p777_p11), [#allocation3], %s187_s5 }
  0x3e   : > { %s191_s12 = scalar_lea.vmem (!%p777_p11), [#allocation2], %s374_s6 }
  0x41   : > { %593 = dma.done.wait (%p721_p8), %s188_s7, 128  }
  0x42   : > { %595 = vsyncadd (%p721_p8), %s188_s7, 4294967168  ;;  %s197_s0 = scalar_lea.sflag [#allocation6], %s187_s5  ;;  %s200_s19 = scalar_lea.vmem [#allocation5], %s374_s6 }
  0x43   : > { %597 = dma.done.wait (%p721_p8), %s197_s0, 128  }
  0x44   : > { %599 = vsyncadd (%p721_p8), %s197_s0, 4294967168  ;;  %s223_s24 = sand.u32 1, %s610_s10   ;;  %v237_v0 = vld [vmem:[%s191_s12] sm:$0xff]  ;;  %v238_v1 = vld [vmem:[%s200_s19] sm:$0xff]  ;;  %s379_s22 = sshll.u32 %s630_s15, 7 }
  0x45   : > { %s376_s8 = sshll.u32 %s223_s24, 3  ;;  %v239_v2 = vsub.f32 %v237_v0, %v238_v1  ;;  %s262_s18 = scalar_lea.hbm %s852_s2, %s379_s22 }
  0x46   : > { %s225_s27 = scalar_lea.vmem [#allocation7], %s376_s8  ;;  %s251_s21 = scalar_lea.sflag [#allocation4], %s223_s24 }
  0x47   : > { %v240_v3 = vand.u32 2147483647, %v239_v2  ;;  %v242_v4 = vmul.f32 %v239_v2, %v239_v2  ;;  %s264_s23 = sshll.u32 %s225_s27, 4  ;;  %s642_s5 = smov [#allocation7]   ;;  %s265_s23 = int_to_ptr.vmem [resolvable:$true] %s264_s23 }
  0x48   : > { %s530_s26 = scalar_lea.vmem %s265_s23, 128  ;;  %s534_s6 = sshll.u32 %s642_s5, 4  ;;  %s535_s6 = int_to_ptr.vmem [resolvable:$false] %s534_s6 }
  0x49   : > { %v243_v5 = vmul.f32 2.0, %v240_v3  ;;  %vm241_vm0 = vcmp.lt.f32.partialorder %v240_v3, 1.0  ;;  %p531_p8 = scmp.ne.s32.totalorder %s265_s23, %s530_s26  ;;  %s536_s7 = scalar_lea.vmem %s535_s6, 256 }
  0x4a   : > { %p537_p4 = scmp.lt.s32.totalorder %s265_s23, %s535_s6  ;;  %p538_p11 = scmp.lt.s32.totalorder %s536_s7, %s530_s26 }
  0x4b   : > { %v377_v6 = vadd.f32 -1.0, %v243_v5  ;;  %p532_p5 = pnand %p531_p8, %p739_p1 }
  0x4c   : > { %p539_p2 = por %p538_p11, %p537_p4 }
  0x4d   : > { %v245_v7 = vsel %vm241_vm0, %v242_v4, %v377_v6  ;;  %p533_p10 = pneg %p532_p5 }
  0x4e   : > { %249 = vst [vmem:[%s225_s27] sm:$0xff] %v245_v7 }
  0x4f   : > { %p540_p12 = pnand %p539_p2, %p533_p10 }
  0x51   : > { %543 = shalt.err (!%p540_p12)
}
  0x52   : > { %s544_s15 = scalar_lea.hbm %s262_s18, 128  ;;  %s548_s19 = scalar_lea.hbm %s852_s2, 256 }
  0x53   : > { %p545_p13 = scmp.ne.s32.totalorder %s262_s18, %s544_s15  ;;  %p549_p6 = scmp.lt.s32.totalorder %s262_s18, %s852_s2 }
  0x54   : > { %p550_p0 = scmp.lt.s32.totalorder %s548_s19, %s544_s15 }
  0x55   : > { %p546_p7 = pnand %p545_p13, %p739_p1 }
  0x56   : > { %p551_p8 = por %p550_p0, %p549_p6 }
  0x57   : > { %p547_p9 = pneg %p546_p7 }
  0x59   : > { %p552_p5 = pnand %p551_p8, %p547_p9 }
  0x5b   : > { %555 = shalt.err (!%p552_p5)
}
  0x5c   : > { %386 = dma.vmem_to_hbm [thread:$0]  (%p739_p1), %s265_s23, 128, %s262_s18, %s251_s21  }
  0x5d PF: > { %s276_s22 = sand.u32 1, %s606_s9   ;;  %p861_p10 = scmp.ge.s32.totalorder %s638_s17, 2 }
  0x5e   : > { %s277_s27 = scalar_lea.sflag [#allocation4], %s276_s22 }
  0x5f   : > { %p396_p4 = pnand %p861_p10, %p744_p3 }
  0x61   : > { %p397_p11 = pneg %p396_p4 }
  0x63   : > { %601 = dma.done.wait (%p397_p11), %s277_s27, 128  }
  0x64   : > { %603 = vsyncadd (%p397_p11), %s277_s27, 4294967168  ;;  %s21_s17 = sadd.s32 1, %s638_s17   ;;  %s862_s9 = smov %s610_s10 }
  0x65   : > { %p18_p2 = scmp.ge.s32.totalorder %s21_s17, 4   ;;  %s863_s10 = smov %s614_s11 }
  0x66   : > { %s864_s11 = smov %s730_s29  ;;  %s865_s12 = smov %s622_s13 }
  0x67   : > { %s866_s13 = smov %s626_s14  ;;  %s867_s14 = smov %s733_s30 }
  0x68   : > { %s868_s15 = smov %s634_s16  ;;  %s869_s16 = smov %s871_s20 }
  0x69   :  { %20 = sbr.rel (!%p18_p2) target bundleno = 12 (0xc), region = 90 }
  0x6e   :  { %282 = vsyncpa [#allocation3], 1 }
  0x6f   :  { %284 = vsyncpa [#allocation3 + $0x1], 1 }
  0x70   :  { %285 = vsyncpa [#allocation6], 1 }
  0x71   :  { %287 = vsyncpa [#allocation6 + $0x1], 1 }
  0x72   :  { %288 = vsyncpa [#allocation4], 1 }
  0x73   :  { %290 = vsyncpa [#allocation4 + $0x1], 1 }

</bundles_post_ra>
